<compile_context>
chip_gen: v7x
topology: tpu7x:2x2x1
jax: 0.10.0
libtpu: 0.0.40
codegen_flags: <defaults>
</compile_context>

<pallas_src>
import functools

import jax
import jax.numpy as jnp
from jax.experimental import pallas as pl
from jax.experimental.pallas import tpu as pltpu


def _mlp_kernel(w1_ref, b1_ref, c_ref, b2_ref, x_ref, o_ref):
    # w1_ref: (3,5) SMEM  = 0.5*w1
    # b1_ref: (5,)  SMEM  = 0.5*b1
    # c_ref : (5,)  SMEM  = 0.25*w2
    # b2_ref: (1,)  SMEM  = 0.5*b2 + 0.25*sum(w2)
    # x_ref : (3, TR, 128) VMEM block (batch on sublanes+lanes, feature-major)
    # o_ref : (TR, 128)    VMEM block
    #
    # Hoist all SMEM scalar reads off the vector critical path.
    w = [[w1_ref[f, j] for f in range(3)] for j in range(5)]
    b1 = [b1_ref[j] for j in range(5)]
    c = [c_ref[j] for j in range(5)]
    b2 = b2_ref[0]

    x0 = x_ref[0]                                   # (TR, 128) full vregs
    x1 = x_ref[1]
    x2 = x_ref[2]

    acc = None
    for j in range(5):                              # fully unrolled: 5 hidden units
        hj = b1[j] + w[j][0] * x0 + w[j][1] * x1 + w[j][2] * x2
        t = c[j] * jnp.tanh(hj)                     # tanh -> EUP slot
        acc = t if acc is None else acc + t
    o_ref[...] = 0.5 * jnp.tanh(acc + b2) + 0.5     # final sigmoid, folded


@functools.partial(jax.jit, static_argnames=("tr",))
def clarification_model(x, w1, b1, w2, b2, *, tr=2048):
    """x: (B, 3) f32; w1: (3, 5); b1: (5,); w2: (5,); b2: (1,)  ->  (B, 1) f32."""
    B = x.shape[0]

    # Fold the sigmoid affine constants into the parameters (exact algebra:
    # sigmoid(h) = 0.5*tanh(0.5*h) + 0.5).
    w1h = 0.5 * w1.astype(jnp.float32)
    b1h = 0.5 * b1.astype(jnp.float32)
    ch = 0.25 * w2.astype(jnp.float32)
    b2h = 0.5 * b2.astype(jnp.float32) + 0.25 * jnp.sum(w2.astype(jnp.float32))

    # Single fused producer: cast + transpose + pad (one HBM copy), then a free
    # reshape to (3, rows, 128). Pad only to a multiple of 1024 (= 8 sublanes x
    # 128 lanes) so every block is sublane/lane aligned — NOT to a tile multiple.
    # TODO(synk): take x already feature-major upstream to drop this copy.
    bp = ((B + 1023) // 1024) * 1024
    xt = jnp.pad(x.astype(jnp.float32).T, ((0, 0), (0, bp - B)))   # (3, bp)
    rows = bp // 128
    xt3 = xt.reshape(3, rows, 128)                                  # free reshape

    # Tile size: rows per grid step (multiple of 8, capped at rows).
    tr = max(8, min((tr // 8) * 8, rows))
    # Keep >= 2 grid steps when there is enough work so both v7x TCs are used.
    if rows > 8 and pl.cdiv(rows, tr) < 2:
        tr = max(8, ((rows // 2 + 7) // 8) * 8)
    grid_len = pl.cdiv(rows, tr)

    smem = pl.BlockSpec(memory_space=pltpu.MemorySpace.SMEM)
    cost = pl.CostEstimate(flops=45 * bp, transcendentals=6 * bp,
                           bytes_accessed=16 * bp)

    out = pl.pallas_call(
        _mlp_kernel,
        out_shape=jax.ShapeDtypeStruct((rows, 128), jnp.float32),
        grid=(grid_len,),
        in_specs=[
            smem,                                            # w1' scalars
            smem,                                            # b1'
            smem,                                            # c = 0.25*w2
            smem,                                            # b2'
            pl.BlockSpec((3, tr, 128), lambda i: (0, i, 0)),  # x slab
        ],
        out_specs=pl.BlockSpec((tr, 128), lambda i: (i, 0)),  # lane-dense out
        compiler_params=pltpu.CompilerParams(
            dimension_semantics=("parallel",),                # megacore sharding
        ),
        cost_estimate=cost,
    )(w1h, b1h, ch, b2h, xt3)

    # (rows, 128) -> (bp, 1) is a free reshape; slice off padding.
    return out.reshape(bp, 1)[:B]


def init_params(key):
    """Mimics nn.Linear's U(-1/sqrt(fan_in), +1/sqrt(fan_in)) init.

    Weights stored transposed ((in_features, out_features)) so y = x @ w + b,
    identical to the PyTorch module's forward.
    """
    k1, k2, k3, k4 = jax.random.split(key, 4)
    lim1 = 1.0 / jnp.sqrt(3.0)
    lim2 = 1.0 / jnp.sqrt(5.0)
    w1 = jax.random.uniform(k1, (3, 5), jnp.float32, -lim1, lim1)
    b1 = jax.random.uniform(k2, (5,), jnp.float32, -lim1, lim1)
    w2 = jax.random.uniform(k3, (5,), jnp.float32, -lim2, lim2)
    b2 = jax.random.uniform(k4, (1,), jnp.float32, -lim2, lim2)
    return w1, b1, w2, b2


def reference(x, w1, b1, w2, b2):
    h = jax.nn.sigmoid(x @ w1 + b1)
    return jax.nn.sigmoid(h @ w2[:, None] + b2)


if __name__ == "__main__":
    key = jax.random.PRNGKey(0)
    kx, kp, kx2 = jax.random.split(key, 3)
    w1, b1, w2, b2 = init_params(kp)

    # Small batch consistent with the PyTorch module's (B, 3) input.
    B = 8
    x = jax.random.normal(kx, (B, 3), jnp.float32)
    out = jax.block_until_ready(clarification_model(x, w1, b1, w2, b2))
    ref = reference(x, w1, b1, w2, b2)
    assert out.shape == (B, 1)
    assert jnp.allclose(out, ref, atol=1e-5, rtol=1e-5)

    # Non-multiple-of-128 batch with a small tile: exercises padding, a
    # multi-step grid and a partial last block.
    x2 = jax.random.normal(kx2, (2500, 3), jnp.float32)
    out2 = jax.block_until_ready(clarification_model(x2, w1, b1, w2, b2, tr=16))
    ref2 = reference(x2, w1, b1, w2, b2)
    assert out2.shape == (2500, 1)
    assert jnp.allclose(out2, ref2, atol=1e-5, rtol=1e-5)

    print("KERNEL_OK")
</pallas_src>

<mosaic_0001>
module attributes {stable_mosaic.version = 11 : i64} {
  func.func @_mlp_kernel(%arg0: i32, %arg1: memref<3x5xf32, #tpu.memory_space<smem>>, %arg2: memref<5xf32, #tpu.memory_space<smem>>, %arg3: memref<5xf32, #tpu.memory_space<smem>>, %arg4: memref<1xf32, #tpu.memory_space<smem>>, %arg5: memref<3x8x128xf32, #tpu.memory_space<vmem>>, %arg6: memref<8x128xf32, #tpu.memory_space<vmem>>) attributes {dimension_semantics = [#tpu.dimension_semantics<parallel>], iteration_bounds = array<i64: 1>, scalar_prefetch = 0 : i64, scratch_operands = 0 : i64, tpu.core_type = #tpu.core_type<tc>, window_params = [{transform_indices = @transform_0, window_bounds = array<i64: 3, 5>}, {transform_indices = @transform_1, window_bounds = array<i64: 5>}, {transform_indices = @transform_2, window_bounds = array<i64: 5>}, {transform_indices = @transform_3, window_bounds = array<i64: 1>}, {transform_indices = @transform_4, window_bounds = array<i64: 3, 8, 128>}, {transform_indices = @transform_5, window_bounds = array<i64: 8, 128>}]} {
    %c0 = arith.constant 0 : index
    %c0_0 = arith.constant 0 : index
    %0 = memref.load %arg1[%c0, %c0_0] : memref<3x5xf32, #tpu.memory_space<smem>>
    %c1 = arith.constant 1 : index
    %c0_1 = arith.constant 0 : index
    %1 = memref.load %arg1[%c1, %c0_1] : memref<3x5xf32, #tpu.memory_space<smem>>
    %c2 = arith.constant 2 : index
    %c0_2 = arith.constant 0 : index
    %2 = memref.load %arg1[%c2, %c0_2] : memref<3x5xf32, #tpu.memory_space<smem>>
    %c0_3 = arith.constant 0 : index
    %c1_4 = arith.constant 1 : index
    %3 = memref.load %arg1[%c0_3, %c1_4] : memref<3x5xf32, #tpu.memory_space<smem>>
    %c1_5 = arith.constant 1 : index
    %c1_6 = arith.constant 1 : index
    %4 = memref.load %arg1[%c1_5, %c1_6] : memref<3x5xf32, #tpu.memory_space<smem>>
    %c2_7 = arith.constant 2 : index
    %c1_8 = arith.constant 1 : index
    %5 = memref.load %arg1[%c2_7, %c1_8] : memref<3x5xf32, #tpu.memory_space<smem>>
    %c0_9 = arith.constant 0 : index
    %c2_10 = arith.constant 2 : index
    %6 = memref.load %arg1[%c0_9, %c2_10] : memref<3x5xf32, #tpu.memory_space<smem>>
    %c1_11 = arith.constant 1 : index
    %c2_12 = arith.constant 2 : index
    %7 = memref.load %arg1[%c1_11, %c2_12] : memref<3x5xf32, #tpu.memory_space<smem>>
    %c2_13 = arith.constant 2 : index
    %c2_14 = arith.constant 2 : index
    %8 = memref.load %arg1[%c2_13, %c2_14] : memref<3x5xf32, #tpu.memory_space<smem>>
    %c0_15 = arith.constant 0 : index
    %c3 = arith.constant 3 : index
    %9 = memref.load %arg1[%c0_15, %c3] : memref<3x5xf32, #tpu.memory_space<smem>>
    %c1_16 = arith.constant 1 : index
    %c3_17 = arith.constant 3 : index
    %10 = memref.load %arg1[%c1_16, %c3_17] : memref<3x5xf32, #tpu.memory_space<smem>>
    %c2_18 = arith.constant 2 : index
    %c3_19 = arith.constant 3 : index
    %11 = memref.load %arg1[%c2_18, %c3_19] : memref<3x5xf32, #tpu.memory_space<smem>>
    %c0_20 = arith.constant 0 : index
    %c4 = arith.constant 4 : index
    %12 = memref.load %arg1[%c0_20, %c4] : memref<3x5xf32, #tpu.memory_space<smem>>
    %c1_21 = arith.constant 1 : index
    %c4_22 = arith.constant 4 : index
    %13 = memref.load %arg1[%c1_21, %c4_22] : memref<3x5xf32, #tpu.memory_space<smem>>
    %c2_23 = arith.constant 2 : index
    %c4_24 = arith.constant 4 : index
    %14 = memref.load %arg1[%c2_23, %c4_24] : memref<3x5xf32, #tpu.memory_space<smem>>
    %c0_25 = arith.constant 0 : index
    %15 = memref.load %arg2[%c0_25] : memref<5xf32, #tpu.memory_space<smem>>
    %c1_26 = arith.constant 1 : index
    %16 = memref.load %arg2[%c1_26] : memref<5xf32, #tpu.memory_space<smem>>
    %c2_27 = arith.constant 2 : index
    %17 = memref.load %arg2[%c2_27] : memref<5xf32, #tpu.memory_space<smem>>
    %c3_28 = arith.constant 3 : index
    %18 = memref.load %arg2[%c3_28] : memref<5xf32, #tpu.memory_space<smem>>
    %c4_29 = arith.constant 4 : index
    %19 = memref.load %arg2[%c4_29] : memref<5xf32, #tpu.memory_space<smem>>
    %c0_30 = arith.constant 0 : index
    %20 = memref.load %arg3[%c0_30] : memref<5xf32, #tpu.memory_space<smem>>
    %c1_31 = arith.constant 1 : index
    %21 = memref.load %arg3[%c1_31] : memref<5xf32, #tpu.memory_space<smem>>
    %c2_32 = arith.constant 2 : index
    %22 = memref.load %arg3[%c2_32] : memref<5xf32, #tpu.memory_space<smem>>
    %c3_33 = arith.constant 3 : index
    %23 = memref.load %arg3[%c3_33] : memref<5xf32, #tpu.memory_space<smem>>
    %c4_34 = arith.constant 4 : index
    %24 = memref.load %arg3[%c4_34] : memref<5xf32, #tpu.memory_space<smem>>
    %c0_35 = arith.constant 0 : index
    %25 = memref.load %arg4[%c0_35] : memref<1xf32, #tpu.memory_space<smem>>
    %c0_36 = arith.constant 0 : index
    %c0_37 = arith.constant 0 : index
    %c0_38 = arith.constant 0 : index
    %26 = vector.load %arg5[%c0_36, %c0_37, %c0_38] : memref<3x8x128xf32, #tpu.memory_space<vmem>>, vector<1x8x128xf32>
    %27 = vector.shape_cast %26 : vector<1x8x128xf32> to vector<8x128xf32>
    %c1_39 = arith.constant 1 : index
    %c0_40 = arith.constant 0 : index
    %c0_41 = arith.constant 0 : index
    %28 = vector.load %arg5[%c1_39, %c0_40, %c0_41] : memref<3x8x128xf32, #tpu.memory_space<vmem>>, vector<1x8x128xf32>
    %29 = vector.shape_cast %28 : vector<1x8x128xf32> to vector<8x128xf32>
    %c2_42 = arith.constant 2 : index
    %c0_43 = arith.constant 0 : index
    %c0_44 = arith.constant 0 : index
    %30 = vector.load %arg5[%c2_42, %c0_43, %c0_44] : memref<3x8x128xf32, #tpu.memory_space<vmem>>, vector<1x8x128xf32>
    %31 = vector.shape_cast %30 : vector<1x8x128xf32> to vector<8x128xf32>
    %32 = vector.broadcast %0 : f32 to vector<8x128xf32>
    %33 = arith.mulf %32, %27 : vector<8x128xf32>
    %34 = vector.broadcast %15 : f32 to vector<8x128xf32>
    %35 = arith.addf %34, %33 : vector<8x128xf32>
    %36 = vector.broadcast %1 : f32 to vector<8x128xf32>
    %37 = arith.mulf %36, %29 : vector<8x128xf32>
    %38 = arith.addf %35, %37 : vector<8x128xf32>
    %39 = vector.broadcast %2 : f32 to vector<8x128xf32>
    %40 = arith.mulf %39, %31 : vector<8x128xf32>
    %41 = arith.addf %38, %40 : vector<8x128xf32>
    %42 = math.tanh %41 : vector<8x128xf32>
    %43 = vector.broadcast %20 : f32 to vector<8x128xf32>
    %44 = arith.mulf %43, %42 : vector<8x128xf32>
    %45 = vector.broadcast %3 : f32 to vector<8x128xf32>
    %46 = arith.mulf %45, %27 : vector<8x128xf32>
    %47 = vector.broadcast %16 : f32 to vector<8x128xf32>
    %48 = arith.addf %47, %46 : vector<8x128xf32>
    %49 = vector.broadcast %4 : f32 to vector<8x128xf32>
    %50 = arith.mulf %49, %29 : vector<8x128xf32>
    %51 = arith.addf %48, %50 : vector<8x128xf32>
    %52 = vector.broadcast %5 : f32 to vector<8x128xf32>
    %53 = arith.mulf %52, %31 : vector<8x128xf32>
    %54 = arith.addf %51, %53 : vector<8x128xf32>
    %55 = math.tanh %54 : vector<8x128xf32>
    %56 = vector.broadcast %21 : f32 to vector<8x128xf32>
    %57 = arith.mulf %56, %55 : vector<8x128xf32>
    %58 = arith.addf %44, %57 : vector<8x128xf32>
    %59 = vector.broadcast %6 : f32 to vector<8x128xf32>
    %60 = arith.mulf %59, %27 : vector<8x128xf32>
    %61 = vector.broadcast %17 : f32 to vector<8x128xf32>
    %62 = arith.addf %61, %60 : vector<8x128xf32>
    %63 = vector.broadcast %7 : f32 to vector<8x128xf32>
    %64 = arith.mulf %63, %29 : vector<8x128xf32>
    %65 = arith.addf %62, %64 : vector<8x128xf32>
    %66 = vector.broadcast %8 : f32 to vector<8x128xf32>
    %67 = arith.mulf %66, %31 : vector<8x128xf32>
    %68 = arith.addf %65, %67 : vector<8x128xf32>
    %69 = math.tanh %68 : vector<8x128xf32>
    %70 = vector.broadcast %22 : f32 to vector<8x128xf32>
    %71 = arith.mulf %70, %69 : vector<8x128xf32>
    %72 = arith.addf %58, %71 : vector<8x128xf32>
    %73 = vector.broadcast %9 : f32 to vector<8x128xf32>
    %74 = arith.mulf %73, %27 : vector<8x128xf32>
    %75 = vector.broadcast %18 : f32 to vector<8x128xf32>
    %76 = arith.addf %75, %74 : vector<8x128xf32>
    %77 = vector.broadcast %10 : f32 to vector<8x128xf32>
    %78 = arith.mulf %77, %29 : vector<8x128xf32>
    %79 = arith.addf %76, %78 : vector<8x128xf32>
    %80 = vector.broadcast %11 : f32 to vector<8x128xf32>
    %81 = arith.mulf %80, %31 : vector<8x128xf32>
    %82 = arith.addf %79, %81 : vector<8x128xf32>
    %83 = math.tanh %82 : vector<8x128xf32>
    %84 = vector.broadcast %23 : f32 to vector<8x128xf32>
    %85 = arith.mulf %84, %83 : vector<8x128xf32>
    %86 = arith.addf %72, %85 : vector<8x128xf32>
    %87 = vector.broadcast %12 : f32 to vector<8x128xf32>
    %88 = arith.mulf %87, %27 : vector<8x128xf32>
    %89 = vector.broadcast %19 : f32 to vector<8x128xf32>
    %90 = arith.addf %89, %88 : vector<8x128xf32>
    %91 = vector.broadcast %13 : f32 to vector<8x128xf32>
    %92 = arith.mulf %91, %29 : vector<8x128xf32>
    %93 = arith.addf %90, %92 : vector<8x128xf32>
    %94 = vector.broadcast %14 : f32 to vector<8x128xf32>
    %95 = arith.mulf %94, %31 : vector<8x128xf32>
    %96 = arith.addf %93, %95 : vector<8x128xf32>
    %97 = math.tanh %96 : vector<8x128xf32>
    %98 = vector.broadcast %24 : f32 to vector<8x128xf32>
    %99 = arith.mulf %98, %97 : vector<8x128xf32>
    %100 = arith.addf %86, %99 : vector<8x128xf32>
    %101 = vector.broadcast %25 : f32 to vector<8x128xf32>
    %102 = arith.addf %100, %101 : vector<8x128xf32>
    %103 = math.tanh %102 : vector<8x128xf32>
    %cst = arith.constant 5.000000e-01 : f32
    %104 = vector.broadcast %cst : f32 to vector<8x128xf32>
    %105 = arith.mulf %104, %103 : vector<8x128xf32>
    %cst_45 = arith.constant 5.000000e-01 : f32
    %106 = vector.broadcast %cst_45 : f32 to vector<8x128xf32>
    %107 = arith.addf %105, %106 : vector<8x128xf32>
    %c0_46 = arith.constant 0 : index
    %c0_47 = arith.constant 0 : index
    %108 = vector.load %arg6[%c0_46, %c0_47] : memref<8x128xf32, #tpu.memory_space<vmem>>, vector<8x128xf32>
    tpu.vector_store %arg6[%c0_46, %c0_47], %107 {strides = array<i32>} : memref<8x128xf32, #tpu.memory_space<vmem>>, vector<8x128xf32>,
    return
  }
  func.func @transform_0(%arg0: i32) -> (i32, i32) {
    %c0_i32 = arith.constant 0 : i32
    %c0_i32_0 = arith.constant 0 : i32
    %c0_i32_1 = arith.constant 0 : i32
    return %c0_i32, %c0_i32_0 : i32, i32
  }
  func.func @transform_1(%arg0: i32) -> i32 {
    %c0_i32 = arith.constant 0 : i32
    %c0_i32_0 = arith.constant 0 : i32
    return %c0_i32 : i32
  }
  func.func @transform_2(%arg0: i32) -> i32 {
    %c0_i32 = arith.constant 0 : i32
    %c0_i32_0 = arith.constant 0 : i32
    return %c0_i32 : i32
  }
  func.func @transform_3(%arg0: i32) -> i32 {
    %c0_i32 = arith.constant 0 : i32
    %c0_i32_0 = arith.constant 0 : i32
    return %c0_i32 : i32
  }
  func.func @transform_4(%arg0: i32) -> (i32, i32, i32) {
    %c0_i32 = arith.constant 0 : i32
    %c0_i32_0 = arith.constant 0 : i32
    %c0_i32_1 = arith.constant 0 : i32
    return %c0_i32, %arg0, %c0_i32_0 : i32, i32, i32
  }
  func.func @transform_5(%arg0: i32) -> (i32, i32) {
    %c0_i32 = arith.constant 0 : i32
    %c0_i32_0 = arith.constant 0 : i32
    return %arg0, %c0_i32 : i32, i32
  }
}

</mosaic_0001>

<bundles_post_ra>
// kernel: clarification_model.1
= control target key start
LH: loop header
LB: loop body
LE: loop exit
PB: predicated region body
PF: predicated region fallthrough
CT: control target
= control target key end

     0   :  { %11 = vsyncpa [#allocation4], 0  ;;  %s356_s0 = inlined_call_operand.vmem [shape: f32[3,5], index: 0, kind: input, shape index: {}]   ;;  %s357_s1 = inlined_call_operand.vmem [shape: f32[5], index: 1, kind: input, shape index: {}]   ;;  %s358_s2 = inlined_call_operand.vmem [shape: f32[5], index: 2, kind: input, shape index: {}]   ;;  %s359_s3 = inlined_call_operand.<no memory space> [shape: f32[1], index: 3, kind: input, shape index: {}]   ;;  %s360_s4 = inlined_call_operand.vmem [shape: f32[3,8,128], index: 4, kind: input, shape index: {}]   ;;  %s361_s5 = inlined_call_operand.vmem [shape: f32[8,128], index: 5, kind: output, shape index: {}]  }
   0x1   :  { %12 = vsyncpa [#allocation6], 0  ;;  %s29_s20 = sshll.u32 %s357_s1, 4  ;;  %s19_s23 = sshll.u32 %s356_s0, 4  ;;  %s30_s20 = int_to_ptr.vmem [resolvable:$true] %s29_s20  ;;  %s20_s23 = int_to_ptr.vmem [resolvable:$true] %s19_s23 }
   0x2   :  { %s208_s24 = scalar_lea.vmem %s30_s20, 16  ;;  %p213_p1 = scmp.lt.s32.totalorder %s30_s20, %s30_s20 }
   0x3   :  { %p209_p0 = scmp.ne.s32.totalorder %s30_s20, %s208_s24  ;;  %p214_p2 = scmp.lt.s32.totalorder %s208_s24, %s208_s24 }
   0x5   :  { %p215_p3 = por %p214_p2, %p213_p1 }
   0x7   :  { %p216_p4 = pnand %p215_p3, %p209_p0 }
   0x9   :  { %219 = shalt.err (!%p216_p4)
}
   0xa   :  { %s248_s25 = smov [#allocation5]   ;;  %s220_s26 = scalar_lea.vmem %s20_s23, 64 }
   0xb   :  { %32 = dma.vmem_to_smem %s30_s20, 16, %s248_s25, [#allocation6]  }
   0xc   :  { %p221_p5 = scmp.ne.s32.totalorder %s20_s23, %s220_s26  ;;  %p225_p6 = scmp.lt.s32.totalorder %s20_s23, %s20_s23 }
   0xd   :  { %p226_p7 = scmp.lt.s32.totalorder %s220_s26, %s220_s26 }
   0xf   :  { %p227_p8 = por %p226_p7, %p225_p6 }
  0x11   :  { %p228_p9 = pnand %p227_p8, %p221_p5 }
  0x13   :  { %231 = shalt.err (!%p228_p9)
}
  0x14   :  { %s249_s1 = smov [#allocation3]   ;;  %s39_s28 = sshll.u32 %s358_s2, 4  ;;  %s40_s28 = int_to_ptr.vmem [resolvable:$true] %s39_s28 }
  0x15   :  { %22 = dma.vmem_to_smem %s20_s23, 64, %s249_s1, [#allocation4]  }
  0x16   :  { %s232_s29 = scalar_lea.vmem %s40_s28, 16  ;;  %p237_p11 = scmp.lt.s32.totalorder %s40_s28, %s40_s28 }
  0x17   :  { %p233_p10 = scmp.ne.s32.totalorder %s40_s28, %s232_s29  ;;  %p238_p12 = scmp.lt.s32.totalorder %s232_s29, %s232_s29 }
  0x19   :  { %p239_p13 = por %p238_p12, %p237_p11 }
  0x1b   :  { %p240_p0 = pnand %p239_p13, %p233_p10 }
  0x1d   :  { %243 = shalt.err (!%p240_p0)
}
  0x1e   :  { %s250_s30 = smov [#allocation7]  }
  0x1f   :  { %42 = dma.vmem_to_smem %s40_s28, 16, %s250_s30, [#allocation6]  }
  0x20   :  { %244 = dma.done.wait [#allocation4], 64  }
  0x21   :  { %245 = vsyncadd [#allocation4], 4294967232 }
  0x22   :  { %246 = dma.done.wait [#allocation6], 32  }
  0x23   :  { %247 = vsyncadd [#allocation6], 4294967264 }
  0x24   :  { %56 = sfence }
  0x25   :  { %s57_s6 = sld [smem:[#allocation3]]  ;;  %s290_s9 = sld [smem:[#allocation3 + $0x1]]  ;;  %v83_v0 = vld [vmem:[%s360_s4] sm:$0xff]  ;;  %v191_v1 = vld [vmem:[%s360_s4 + $0x8] sm:$0xff]  ;;  %v192_v2 = vld [vmem:[%s360_s4 + $0x10] sm:$0xff] }
  0x26   :  { %s169_s7 = sld [smem:[#allocation3 + $0x80]]  ;;  %s292_s2 = sld [smem:[#allocation3 + $0x81]] }
  0x27   :  { %s170_s8 = sld [smem:[#allocation3 + $0x100]]  ;;  %s294_s10 = sld [smem:[#allocation3 + $0x101]] }
  0x28   :  { %s296_s11 = sld [smem:[#allocation3 + $0x2]]  ;;  %s302_s14 = sld [smem:[#allocation3 + $0x3]] }
  0x29   :  { %s298_s12 = sld [smem:[#allocation3 + $0x82]]  ;;  %s304_s15 = sld [smem:[#allocation3 + $0x83]] }
  0x2a   :  { %s300_s13 = sld [smem:[#allocation3 + $0x102]]  ;;  %s306_s16 = sld [smem:[#allocation3 + $0x103]] }
  0x2b   :  { %s311_s19 = sld [smem:[#allocation3 + $0x4]]  ;;  %v88_v3 = vstv %s57_s6  ;;  %s323_s26 = sld [smem:[#allocation5]]  ;;  %v101_v6 = vstv %s290_s9 }
  0x2c   :  { %s313_s20 = sld [smem:[#allocation3 + $0x84]]  ;;  %v92_v4 = vstv %s169_s7  ;;  %s326_s1 = sld [smem:[#allocation5 + $0x1]]  ;;  %v89_v7 = vmul.f32 %v88_v3, %v83_v0  ;;  %v105_v8 = vstv %s292_s2  ;;  %v102_v14 = vmul.f32 %v101_v6, %v83_v0 }
  0x2d   :  { %s321_s25 = sld [smem:[#allocation3 + $0x104]]  ;;  %v95_v5 = vstv %s170_s8  ;;  %s328_s0 = sld [smem:[#allocation5 + $0x2]]  ;;  %v108_v9 = vstv %s294_s10  ;;  %v93_v10 = vmul.f32 %v191_v1, %v92_v4  ;;  %v106_v15 = vmul.f32 %v191_v1, %v105_v8 }
  0x2e   :  { %s332_s4 = sld [smem:[#allocation5 + $0x3]]  ;;  %s334_s27 = sld [smem:[#allocation5 + $0x4]]  ;;  %v96_v11 = vmul.f32 %v192_v2, %v95_v5  ;;  %v115_v12 = vstv %s296_s11  ;;  %v129_v17 = vstv %s302_s14  ;;  %v109_v18 = vmul.f32 %v192_v2, %v108_v9 }
  0x2f   :  { %v119_v13 = vstv %s298_s12  ;;  %v116_v19 = vmul.f32 %v115_v12, %v83_v0  ;;  %v133_v21 = vstv %s304_s15  ;;  %v130_v23 = vmul.f32 %v129_v17, %v83_v0  ;;  %s77_s28 = sld [smem:[#allocation7]]  ;;  %s187_s29 = sld [smem:[#allocation7 + $0x1]] }
  0x30   :  { %v122_v16 = vstv %s300_s13  ;;  %v120_v20 = vmul.f32 %v191_v1, %v119_v13  ;;  %v136_v24 = vstv %s306_s16  ;;  %v134_v27 = vmul.f32 %v191_v1, %v133_v21  ;;  %s188_s30 = sld [smem:[#allocation7 + $0x2]]  ;;  %s189_s6 = sld [smem:[#allocation7 + $0x3]] }
  0x31   :  { %v123_v22 = vmul.f32 %v192_v2, %v122_v16  ;;  %v143_v25 = vstv %s311_s19  ;;  %v90_v26 = vstv %s323_s26  ;;  %v137_v40 = vmul.f32 %v192_v2, %v136_v24  ;;  %s190_s7 = sld [smem:[#allocation7 + $0x4]] }
  0x32   :  { %v144_v28 = vmul.f32 %v143_v25, %v83_v0  ;;  %v147_v29 = vstv %s313_s20  ;;  %v91_v30 = vadd.f32 %v90_v26, %v89_v7  ;;  %v103_v31 = vstv %s326_s1 }
  0x33   :  { %v117_v32 = vstv %s328_s0  ;;  %v150_v33 = vstv %s321_s25  ;;  %v104_v34 = vadd.f32 %v103_v31, %v102_v14  ;;  %v148_v41 = vmul.f32 %v191_v1, %v147_v29 }
  0x34   :  { %v118_v35 = vadd.f32 %v117_v32, %v116_v19  ;;  %v131_v36 = vstv %s332_s4  ;;  %v145_v37 = vstv %s334_s27  ;;  %v94_v38 = vadd.f32 %v93_v10, %v91_v30 }
  0x35   :  { %v132_v39 = vadd.f32 %v131_v36, %v130_v23  ;;  %v107_v42 = vadd.f32 %v106_v15, %v104_v34  ;;  %v146_v46 = vadd.f32 %v145_v37, %v144_v28  ;;  %v151_v47 = vmul.f32 %v192_v2, %v150_v33 }
  0x36   :  { %v121_v43 = vadd.f32 %v120_v20, %v118_v35  ;;  %v97_v44 = vadd.f32 %v96_v11, %v94_v38  ;;  %v99_v53 = vstv %s77_s28  ;;  %v112_v54 = vstv %s187_s29 }
  0x37   :  { %v135_v45 = vadd.f32 %v134_v27, %v132_v39  ;;  %v110_v48 = vadd.f32 %v109_v18, %v107_v42  ;;  %v149_v51 = vadd.f32 %v148_v41, %v146_v46  ;;  %v126_v56 = vstv %s188_s30 }
  0x38   :  { %v124_v49 = vadd.f32 %v123_v22, %v121_v43  ;;  %196 = vtanh.f32 %v97_v44  ;;  %v140_v59 = vstv %s189_s6  ;;  %v154_v0 = vstv %s190_s7 }
  0x39   :  { %v138_v50 = vadd.f32 %v137_v40, %v135_v45  ;;  %198 = vtanh.f32 %v110_v48  ;;  %v152_v52 = vadd.f32 %v151_v47, %v149_v51  ;;  %v157_v7 = vstv %s359_s3 }
  0x3a   :  { %200 = vtanh.f32 %v124_v49 }
  0x3b   :  { %202 = vtanh.f32 %v138_v50 }
  0x3c   :  { %204 = vtanh.f32 %v152_v52 }
  0x42   :  { %v197_v55 = vpop.eup %196 }
  0x43   :  { %v199_v57 = vpop.eup %198  ;;  %v100_v58 = vmul.f32 %v197_v55, %v99_v53 }
  0x44   :  { %v201_v60 = vpop.eup %200  ;;  %v113_v61 = vmul.f32 %v199_v57, %v112_v54 }
  0x45   :  { %v203_v62 = vpop.eup %202  ;;  %v127_v63 = vmul.f32 %v201_v60, %v126_v56 }
  0x46   :  { %v205_v1 = vpop.eup %204  ;;  %v114_v2 = vadd.f32 %v113_v61, %v100_v58  ;;  %v141_v3 = vmul.f32 %v203_v62, %v140_v59 }
  0x47   :  { %v155_v5 = vmul.f32 %v205_v1, %v154_v0 }
  0x48   :  { %v128_v4 = vadd.f32 %v127_v63, %v114_v2 }
  0x4a   :  { %v142_v6 = vadd.f32 %v141_v3, %v128_v4 }
  0x4c   :  { %v156_v8 = vadd.f32 %v155_v5, %v142_v6 }
  0x4e   :  { %v158_v9 = vadd.f32 %v157_v7, %v156_v8 }
  0x50   :  { %206 = vtanh.f32 %v158_v9 }
  0x5a   :  { %v207_v10 = vpop.eup %206 }
  0x5b   :  { %v160_v11 = vmul.f32 0.5, %v207_v10 }
  0x5d   :  { %v161_v12 = vadd.f32 0.5, %v160_v11 }
  0x5f   :  { %162 = vst [vmem:[%s361_s5] sm:$0xff] %v161_v12 }
  0x60   :  { %167 = vsyncpa [#allocation4], 1 }
  0x61   :  { %168 = vsyncpa [#allocation6], 1 }

</bundles_post_ra>
